<compile_context>
chip_gen: v5e
topology: v5e:2x2
jax: 0.10.0
libtpu: 0.0.40
codegen_flags: <defaults>
</compile_context>

<pallas_src>
import numpy as np
import jax
import jax.numpy as jnp
from jax.experimental import pallas as pl
from jax.experimental.pallas import tpu as pltpu


def _round_up(x, m):
    return ((x + m - 1) // m) * m


# ---------------------------------------------------------------------------
# Pallas kernel: segment-sparse GraphConv (norm='right') + bias + PReLU
# ---------------------------------------------------------------------------
def _graphconv_prelu_kernel(rseg_ref, iseg_ref, nk_ref, ktab_ref,       # prefetch (SMEM)
                            alpha_ref, adj_ref, hp_ref, invdeg_ref, b_ref,  # inputs
                            o_ref,                                           # output
                            acc_ref):                                        # scratch
    s = pl.program_id(0)      # non-empty (relation, dst-row-tile) segment
    kk = pl.program_id(1)     # position in the segment's non-empty k-tile list

    @pl.when(kk == 0)
    def _():
        acc_ref[...] = jnp.zeros_like(acc_ref)

    # Only real (non-padded) k entries contribute.  Padded entries repeat the
    # previous tile index, so their DMA is elided and the MXU work is skipped.
    @pl.when(kk < nk_ref[s])
    def _():
        # int8 adjacency -> f32 -> bf16 (exact for edge counts <= 127), MXU matmul
        adj = adj_ref[0].astype(jnp.float32).astype(jnp.bfloat16)
        acc_ref[...] += jnp.dot(adj, hp_ref[0],
                                preferred_element_type=jnp.float32)

    @pl.when(kk == pl.num_programs(1) - 1)
    def _():
        alpha = alpha_ref[rseg_ref[s]]             # PReLU slope (scalar, SMEM)
        # right normalization (exact inv-degree from the wrapper) + bias + PReLU
        z = acc_ref[...] * invdeg_ref[0] + b_ref[0]
        o_ref[0] = jnp.where(z > 0.0, z, alpha * z)


def _pick_tile(n_max, dh_p):
    """Largest dst/src tile whose pipeline footprint fits a conservative VMEM
    budget (safe on v5e scoped default, v6e, and v7x's 64 MiB physical)."""
    budget = 20 * 1024 * 1024
    best = 128
    for t in (128, 256, 512):
        if t > max(128, _round_up(n_max, 128)):
            break
        foot = (2 * t * t                 # adjacency tile, int8, double-buffered
                + 2 * t * dh_p * 2        # projected features, bf16
                + 2 * t * 4               # inv-degree column
                + 2 * dh_p * 4            # bias
                + t * dh_p * 4            # accumulator scratch
                + 2 * t * dh_p * 4)       # resident output block
        if foot <= budget:
            best = t
    return best


def graph_conv_prelu_batched(adj_i8, hproj, invdeg, bias, alpha,
                             rseg, iseg, nk, ktab_flat, kmax, tile):
    """adj_i8: (R, Np, Np) int8, hproj: (R, Np, Dh_p) bf16 (= H @ W, padded),
    invdeg: (R, Np, 1) f32, bias: (R, 1, Dh_p) f32, alpha: (R,) f32.
    rseg/iseg/nk: (S,) int32, ktab_flat: (S*kmax,) int32 (non-empty k tiles).
    Returns (R, Np, Dh_p) f32; only blocks belonging to a segment are written."""
    R, np_, _ = adj_i8.shape
    dh_p = hproj.shape[-1]
    S = rseg.shape[0]
    t = tile

    def adj_map(s, kk, rseg, iseg, nk, ktab):
        return (rseg[s], iseg[s], ktab[s * kmax + kk])

    def hp_map(s, kk, rseg, iseg, nk, ktab):
        return (rseg[s], ktab[s * kmax + kk], 0)

    def row_map(s, kk, rseg, iseg, nk, ktab):
        return (rseg[s], iseg[s], 0)

    def rel_map(s, kk, rseg, iseg, nk, ktab):
        return (rseg[s], 0, 0)

    return pl.pallas_call(
        _graphconv_prelu_kernel,
        out_shape=jax.ShapeDtypeStruct((R, np_, dh_p), jnp.float32),
        grid_spec=pltpu.PrefetchScalarGridSpec(
            num_scalar_prefetch=4,
            grid=(S, kmax),
            in_specs=[
                pl.BlockSpec(memory_space=pltpu.MemorySpace.SMEM),   # alpha (R,)
                pl.BlockSpec((1, t, t), adj_map),                    # int8 adjacency tile
                pl.BlockSpec((1, t, dh_p), hp_map),                  # projected src features
                pl.BlockSpec((1, t, 1), row_map),                    # exact inv in-degree
                pl.BlockSpec((1, 1, dh_p), rel_map),                 # bias (resident per rel)
            ],
            out_specs=pl.BlockSpec((1, t, dh_p), row_map),
            scratch_shapes=[pltpu.VMEM((t, dh_p), jnp.float32)],     # aggregation acc
        ),
        compiler_params=pltpu.CompilerParams(
            dimension_semantics=("parallel", "arbitrary"),
            vmem_limit_bytes=32 * 1024 * 1024,
        ),
    )(rseg, iseg, nk, ktab_flat, alpha, adj_i8, hproj, invdeg, bias)


# ---------------------------------------------------------------------------
# Glue: ContrastLayer.forward (one batched kernel call for all relations)
# ---------------------------------------------------------------------------
def _str_seed(s):
    return sum((i + 1) * ord(c) for i, c in enumerate(s)) % (2 ** 31 - 1)


def contrast_layer_forward(g, feat, layer_params, base_key):
    """g: dict with 'canonical_etypes', 'edges', 'num_nodes'.
    feat: {ntype: {etype: (N, d_in)}}.
    Returns {ntype: {etype-s_etype: (N_dst, hidden_dim)}}."""
    instances = []
    for (stype, etype, dtype) in g['canonical_etypes']:
        src_ids, dst_ids = g['edges'][etype]
        if src_ids.shape[0] == 0:                    # g.num_edges(etype) == 0
            continue
        w, b, alpha = layer_params[etype]
        in_dim = w.shape[0]
        hs_np = np.asarray(src_ids)
        hd_np = np.asarray(dst_ids)
        for s_etype in feat[stype]:
            feat_src = feat[stype][s_etype]
            key = jax.random.fold_in(base_key, _str_seed(etype + '|' + s_etype))
            if stype == dtype:
                n_total = g['num_nodes'][stype]
                homo_feat = feat_src
                src_off = dst_off = 0
                n_dst = n_total
            else:
                # ntypes ordered alphabetically (matches dgl.to_homogeneous)
                ntypes = sorted([stype, dtype])
                offsets, o = {}, 0
                for nt in ntypes:
                    offsets[nt] = o
                    o += g['num_nodes'][nt]
                n_total = o
                # src nodes get real features; dst nodes get random ones
                # (torch.rand_like) — sized by the dst node count.
                rand_dst = jax.random.uniform(
                    key, (g['num_nodes'][dtype], in_dim), feat_src.dtype)
                feat_by_type = {stype: feat_src, dtype: rand_dst}
                homo_feat = jnp.concatenate([feat_by_type[nt] for nt in ntypes], 0)
                src_off = offsets[stype]
                dst_off = offsets[dtype]
                n_dst = g['num_nodes'][dtype]

            hs = hs_np + src_off
            hd = hd_np + dst_off

            # dense A[dst, src] counts + unconditional self-loops (dgl.add_self_loop
            # adds a loop even if one already exists) — built host-side in numpy
            # so tile occupancy can be computed statically for the sparse grid.
            adj_np = np.zeros((n_total, n_total), np.int32)
            np.add.at(adj_np, (hd, hs), 1)
            adj_np[np.arange(n_total), np.arange(n_total)] += 1
            assert adj_np.max() <= 127, "edge multiplicity exceeds int8-exact range"
            deg = adj_np.sum(axis=1).astype(np.float32)     # in-degree incl. self-loop

            # pre-project features with the relation weight (XLA einsum, f32):
            # D^-1 A (H W) == (D^-1 A H) W, so GraphConv semantics are preserved.
            hproj = homo_feat.astype(jnp.float32) @ w

            instances.append(dict(
                ntype=dtype, name=etype + '-' + s_etype, adj=adj_np, deg=deg,
                hproj=hproj, b=b, alpha=alpha, off=dst_off, n_dst=n_dst,
                n_total=n_total))

    if not instances:
        return {}

    hid_dim = instances[0]['b'].shape[-1]
    dh_p = _round_up(hid_dim, 128)                   # lane-dense output columns
    n_max = max(inst['n_total'] for inst in instances)
    t = _pick_tile(n_max, dh_p)
    np_ = _round_up(max(n_max, t), t)                # tile-aligned node padding
    nt_ = np_ // t
    R = len(instances)

    adj_b = np.zeros((R, np_, np_), np.int8)
    invdeg_b = np.ones((R, np_, 1), np.float32)
    hproj_list, b_list, alpha_list = [], [], []
    segments = []                                    # (r, i, non-empty k tiles)
    for r, inst in enumerate(instances):
        n = inst['n_total']
        adj_b[r, :n, :n] = inst['adj'].astype(np.int8)
        invdeg_b[r, :n, 0] = 1.0 / np.maximum(inst['deg'], 1.0)   # exact D^-1
        occ = adj_b[r].reshape(nt_, t, nt_, t).any(axis=(1, 3))   # (nt_, nt_) bool
        for i in range(nt_):
            ks = np.nonzero(occ[i])[0]
            if ks.size:                              # skip all-zero row tiles
                segments.append((r, i, ks))
        hproj_list.append(jnp.pad(inst['hproj'],
                                  ((0, np_ - n), (0, dh_p - hid_dim))))
        b_list.append(jnp.pad(inst['b'], ((0, 0), (0, dh_p - hid_dim))))
        alpha_list.append(inst['alpha'].reshape(1))

    S = len(segments)
    kmax = max(len(ks) for (_, _, ks) in segments)
    rseg = np.zeros((S,), np.int32)
    iseg = np.zeros((S,), np.int32)
    nk = np.zeros((S,), np.int32)
    ktab = np.zeros((S, kmax), np.int32)
    for si, (r, i, ks) in enumerate(segments):
        rseg[si], iseg[si], nk[si] = r, i, len(ks)
        ktab[si, :len(ks)] = ks
        ktab[si, len(ks):] = ks[-1]                  # repeat last -> DMA elided

    out = graph_conv_prelu_batched(
        jnp.asarray(adj_b),
        jnp.stack(hproj_list).astype(jnp.bfloat16),
        jnp.asarray(invdeg_b),
        jnp.stack(b_list).astype(jnp.float32),
        jnp.concatenate(alpha_list).astype(jnp.float32),
        jnp.asarray(rseg), jnp.asarray(iseg), jnp.asarray(nk),
        jnp.asarray(ktab.reshape(-1)), kmax, t)

    # filter_nodes(_TYPE == predict_type_id) -> dst-type block of rows;
    # slice the real hidden_dim columns back out of the lane-padded slab.
    n_feat = {}
    for r, inst in enumerate(instances):
        blk = out[r, inst['off']:inst['off'] + inst['n_dst'], :hid_dim]
        n_feat.setdefault(inst['ntype'], {})[inst['name']] = blk
    return n_feat


# ---------------------------------------------------------------------------
# Deterministic parameter init (one GraphConv + PReLU per etype)
# ---------------------------------------------------------------------------
def init_contrast_layer(key, in_dim, hidden_dim, etypes):
    params = {}
    for idx, (_, etype, _) in enumerate(etypes):
        k = jax.random.fold_in(key, idx)
        gain = jnp.sqrt(2.0)                                 # relu gain
        std = gain * jnp.sqrt(2.0 / (in_dim + hidden_dim))   # xavier normal
        w = std * jax.random.normal(k, (in_dim, hidden_dim), jnp.float32)
        b = jnp.zeros((1, hidden_dim), jnp.float32)          # GraphConv bias init
        alpha = jnp.array([0.25], jnp.float32)               # nn.PReLU() default
        params[etype] = (w, b, alpha)
    return params


# ---------------------------------------------------------------------------
if __name__ == "__main__":
    key = jax.random.PRNGKey(0)

    in_dim, hidden_dim = 16, 32
    n_user, n_item = 8, 8

    canonical_etypes = [
        ('user', 'buys', 'item'),
        ('item', 'bought-by', 'user'),
        ('user', 'follows', 'user'),
    ]
    num_nodes = {'user': n_user, 'item': n_item}

    # deterministic synthetic edge lists (src_ids, dst_ids) per etype
    u = jnp.arange(n_user, dtype=jnp.int32)
    edges = {
        'buys': (u, (u * 3 + 1) % n_item),
        'bought-by': ((u * 5 + 2) % n_item, u),
        'follows': (u, (u + 1) % n_user),          # no self-edges
    }

    graph = {'canonical_etypes': canonical_etypes,
             'edges': edges,
             'num_nodes': num_nodes}

    # feat: {ntype: {etype (where ntype is dst): Tensor(N, in_dim)}}
    k1, k2, k3, kp, kr = jax.random.split(key, 5)
    feat = {
        'user': {
            'bought-by': jax.random.normal(k1, (n_user, in_dim), jnp.float32),
            'follows': jax.random.normal(k2, (n_user, in_dim), jnp.float32),
        },
        'item': {
            'buys': jax.random.normal(k3, (n_item, in_dim), jnp.float32),
        },
    }

    layer_params = init_contrast_layer(kp, in_dim, hidden_dim, canonical_etypes)

    out = contrast_layer_forward(graph, feat, layer_params, kr)
    out = jax.block_until_ready(out)

    # sanity: every output block is (N_dst, hidden_dim) and finite
    for ntype, rels in out.items():
        for rel, arr in rels.items():
            assert arr.shape == (num_nodes[ntype], hidden_dim), (ntype, rel, arr.shape)
            assert bool(jnp.all(jnp.isfinite(arr)))

    print("KERNEL_OK")
</pallas_src>

<mosaic_0001>
module attributes {stable_mosaic.version = 11 : i64} {
  func.func @_graphconv_prelu_kernel(%arg0: i32, %arg1: i32, %arg2: memref<5xi32, #tpu.memory_space<smem>>, %arg3: memref<5xi32, #tpu.memory_space<smem>>, %arg4: memref<5xi32, #tpu.memory_space<smem>>, %arg5: memref<5xi32, #tpu.memory_space<smem>>, %arg6: memref<5xf32, #tpu.memory_space<smem>>, %arg7: memref<1x128x128xi8, #tpu.memory_space<vmem>>, %arg8: memref<1x128x128xbf16, #tpu.memory_space<vmem>>, %arg9: memref<1x128x1xf32, #tpu.memory_space<vmem>>, %arg10: memref<1x1x128xf32, #tpu.memory_space<vmem>>, %arg11: memref<1x128x128xf32, #tpu.memory_space<vmem>>, %arg12: memref<128x128xf32, #tpu.memory_space<vmem>>) attributes {dimension_semantics = [#tpu.dimension_semantics<parallel>, #tpu.dimension_semantics<arbitrary>], iteration_bounds = array<i64: 5, 1>, scalar_prefetch = 4 : i64, scratch_operands = 1 : i64, tpu.core_type = #tpu.core_type<tc>, window_params = [{transform_indices = @transform_0, window_bounds = array<i64: 5>}, {transform_indices = @transform_1, window_bounds = array<i64: 1, 128, 128>}, {transform_indices = @transform_2, window_bounds = array<i64: 1, 128, 128>}, {transform_indices = @transform_3, window_bounds = array<i64: 1, 128, 1>}, {transform_indices = @transform_4, window_bounds = array<i64: 1, 1, 128>}, {transform_indices = @transform_5, window_bounds = array<i64: 1, 128, 128>}]} {
    %c0_i32 = arith.constant 0 : i32
    %0 = arith.cmpi eq, %arg1, %c0_i32 : i32
    %1 = arith.extui %0 : i1 to i32
    %c0_i32_0 = arith.constant 0 : i32
    %2 = arith.cmpi ne, %1, %c0_i32_0 : i32
    scf.if %2 {
      %cst = arith.constant 0.000000e+00 : f32
      %11 = vector.broadcast %cst : f32 to vector<128x128xf32>
      %c0 = arith.constant 0 : index
      %c0_4 = arith.constant 0 : index
      %12 = vector.load %arg12[%c0, %c0_4] : memref<128x128xf32, #tpu.memory_space<vmem>>, vector<128x128xf32>
      tpu.vector_store %arg12[%c0, %c0_4], %11 {strides = array<i32>} : memref<128x128xf32, #tpu.memory_space<vmem>>, vector<128x128xf32>,
    } else {
    }
    %3 = arith.index_cast %arg0 : i32 to index
    %4 = memref.load %arg4[%3] : memref<5xi32, #tpu.memory_space<smem>>
    %5 = arith.cmpi slt, %arg1, %4 : i32
    %6 = arith.extui %5 : i1 to i32
    %c0_i32_1 = arith.constant 0 : i32
    %7 = arith.cmpi ne, %6, %c0_i32_1 : i32
    scf.if %7 {
      %c0 = arith.constant 0 : index
      %c0_4 = arith.constant 0 : index
      %c0_5 = arith.constant 0 : index
      %11 = vector.load %arg7[%c0, %c0_4, %c0_5] : memref<1x128x128xi8, #tpu.memory_space<vmem>>, vector<1x128x128xi8>
      %12 = vector.shape_cast %11 : vector<1x128x128xi8> to vector<128x128xi8>
      %13 = arith.sitofp %12 : vector<128x128xi8> to vector<128x128xf32>
      %14 = arith.truncf %13 : vector<128x128xf32> to vector<128x128xbf16>
      %c0_6 = arith.constant 0 : index
      %c0_7 = arith.constant 0 : index
      %15 = vector.load %arg12[%c0_6, %c0_7] : memref<128x128xf32, #tpu.memory_space<vmem>>, vector<128x128xf32>
      %c0_8 = arith.constant 0 : index
      %c0_9 = arith.constant 0 : index
      %c0_10 = arith.constant 0 : index
      %16 = vector.load %arg8[%c0_8, %c0_9, %c0_10] : memref<1x128x128xbf16, #tpu.memory_space<vmem>>, vector<1x128x128xbf16>
      %17 = vector.shape_cast %16 : vector<1x128x128xbf16> to vector<128x128xbf16>
      %cst = arith.constant dense<0.000000e+00> : vector<128x128xf32>
      %18 = tpu.matmul %14, %17, %cst {dimension_numbers = #tpu.dot_dimension_numbers<[1], [0], [0], [1], [0, 0, 1, 1], [], []>} : vector<128x128xbf16>, vector<128x128xbf16>, vector<128x128xf32> -> vector<128x128xf32>
      %19 = arith.addf %15, %18 : vector<128x128xf32>
      %c0_11 = arith.constant 0 : index
      %c0_12 = arith.constant 0 : index
      %20 = vector.load %arg12[%c0_11, %c0_12] : memref<128x128xf32, #tpu.memory_space<vmem>>, vector<128x128xf32>
      tpu.vector_store %arg12[%c0_11, %c0_12], %19 {strides = array<i32>} : memref<128x128xf32, #tpu.memory_space<vmem>>, vector<128x128xf32>,
    } else {
    }
    %c0_i32_2 = arith.constant 0 : i32
    %8 = arith.cmpi eq, %arg1, %c0_i32_2 : i32
    %9 = arith.extui %8 : i1 to i32
    %c0_i32_3 = arith.constant 0 : i32
    %10 = arith.cmpi ne, %9, %c0_i32_3 : i32
    scf.if %10 {
      %11 = arith.index_cast %arg0 : i32 to index
      %12 = memref.load %arg2[%11] : memref<5xi32, #tpu.memory_space<smem>>
      %13 = arith.index_cast %12 : i32 to index
      %14 = memref.load %arg6[%13] : memref<5xf32, #tpu.memory_space<smem>>
      %c0 = arith.constant 0 : index
      %c0_4 = arith.constant 0 : index
      %15 = vector.load %arg12[%c0, %c0_4] : memref<128x128xf32, #tpu.memory_space<vmem>>, vector<128x128xf32>
      %c0_5 = arith.constant 0 : index
      %c0_6 = arith.constant 0 : index
      %c0_7 = arith.constant 0 : index
      %16 = vector.load %arg9[%c0_5, %c0_6, %c0_7] : memref<1x128x1xf32, #tpu.memory_space<vmem>>, vector<1x128x1xf32>
      %17 = vector.shape_cast %16 : vector<1x128x1xf32> to vector<128x1xf32>
      %18 = vector.broadcast %17 : vector<128x1xf32> to vector<128x128xf32>
      %19 = arith.mulf %15, %18 : vector<128x128xf32>
      %c0_8 = arith.constant 0 : index
      %c0_9 = arith.constant 0 : index
      %c0_10 = arith.constant 0 : index
      %20 = vector.load %arg10[%c0_8, %c0_9, %c0_10] : memref<1x1x128xf32, #tpu.memory_space<vmem>>, vector<1x1x128xf32>
      %21 = vector.shape_cast %20 : vector<1x1x128xf32> to vector<1x128xf32>
      %22 = vector.broadcast %21 : vector<1x128xf32> to vector<128x128xf32>
      %23 = arith.addf %19, %22 : vector<128x128xf32>
      %cst = arith.constant 0.000000e+00 : f32
      %24 = vector.broadcast %cst : f32 to vector<128x128xf32>
      %25 = arith.cmpf ogt, %23, %24 : vector<128x128xf32>
      %26 = vector.broadcast %14 : f32 to vector<128x128xf32>
      %27 = arith.mulf %26, %23 : vector<128x128xf32>
      %28 = arith.select %25, %23, %27 : vector<128x128xi1>, vector<128x128xf32>
      %c0_11 = arith.constant 0 : index
      %c0_12 = arith.constant 0 : index
      %c0_13 = arith.constant 0 : index
      %29 = vector.load %arg11[%c0_11, %c0_12, %c0_13] : memref<1x128x128xf32, #tpu.memory_space<vmem>>, vector<1x128x128xf32>
      %30 = vector.shape_cast %29 : vector<1x128x128xf32> to vector<128x128xf32>
      %31 = vector.shape_cast %28 : vector<128x128xf32> to vector<1x128x128xf32>
      tpu.vector_store %arg11[%c0_11, %c0_12, %c0_13], %31 {strides = array<i32>} : memref<1x128x128xf32, #tpu.memory_space<vmem>>, vector<1x128x128xf32>,
    } else {
    }
    return
  }
  func.func @transform_0(%arg0: i32, %arg1: i32, %arg2: memref<5xi32, #tpu.memory_space<smem>>, %arg3: memref<5xi32, #tpu.memory_space<smem>>, %arg4: memref<5xi32, #tpu.memory_space<smem>>, %arg5: memref<5xi32, #tpu.memory_space<smem>>) -> i32 {
    %c0_i32 = arith.constant 0 : i32
    %c0_i32_0 = arith.constant 0 : i32
    return %c0_i32 : i32
  }
  func.func @transform_1(%arg0: i32, %arg1: i32, %arg2: memref<5xi32, #tpu.memory_space<smem>>, %arg3: memref<5xi32, #tpu.memory_space<smem>>, %arg4: memref<5xi32, #tpu.memory_space<smem>>, %arg5: memref<5xi32, #tpu.memory_space<smem>>) -> (i32, i32, i32) {
    %0 = arith.index_cast %arg0 : i32 to index
    %1 = memref.load %arg2[%0] : memref<5xi32, #tpu.memory_space<smem>>
    %2 = arith.index_cast %arg0 : i32 to index
    %3 = memref.load %arg3[%2] : memref<5xi32, #tpu.memory_space<smem>>
    %c1_i32 = arith.constant 1 : i32
    %4 = arith.muli %arg0, %c1_i32 : i32
    %5 = arith.addi %4, %arg1 : i32
    %6 = arith.index_cast %5 : i32 to index
    %7 = memref.load %arg5[%6] : memref<5xi32, #tpu.memory_space<smem>>
    %c0_i32 = arith.constant 0 : i32
    return %1, %3, %7 : i32, i32, i32
  }
  func.func @transform_2(%arg0: i32, %arg1: i32, %arg2: memref<5xi32, #tpu.memory_space<smem>>, %arg3: memref<5xi32, #tpu.memory_space<smem>>, %arg4: memref<5xi32, #tpu.memory_space<smem>>, %arg5: memref<5xi32, #tpu.memory_space<smem>>) -> (i32, i32, i32) {
    %0 = arith.index_cast %arg0 : i32 to index
    %1 = memref.load %arg2[%0] : memref<5xi32, #tpu.memory_space<smem>>
    %c1_i32 = arith.constant 1 : i32
    %2 = arith.muli %arg0, %c1_i32 : i32
    %3 = arith.addi %2, %arg1 : i32
    %4 = arith.index_cast %3 : i32 to index
    %5 = memref.load %arg5[%4] : memref<5xi32, #tpu.memory_space<smem>>
    %c0_i32 = arith.constant 0 : i32
    %c0_i32_0 = arith.constant 0 : i32
    return %1, %5, %c0_i32 : i32, i32, i32
  }
  func.func @transform_3(%arg0: i32, %arg1: i32, %arg2: memref<5xi32, #tpu.memory_space<smem>>, %arg3: memref<5xi32, #tpu.memory_space<smem>>, %arg4: memref<5xi32, #tpu.memory_space<smem>>, %arg5: memref<5xi32, #tpu.memory_space<smem>>) -> (i32, i32, i32) {
    %0 = arith.index_cast %arg0 : i32 to index
    %1 = memref.load %arg2[%0] : memref<5xi32, #tpu.memory_space<smem>>
    %2 = arith.index_cast %arg0 : i32 to index
    %3 = memref.load %arg3[%2] : memref<5xi32, #tpu.memory_space<smem>>
    %c0_i32 = arith.constant 0 : i32
    %c0_i32_0 = arith.constant 0 : i32
    return %1, %3, %c0_i32 : i32, i32, i32
  }
  func.func @transform_4(%arg0: i32, %arg1: i32, %arg2: memref<5xi32, #tpu.memory_space<smem>>, %arg3: memref<5xi32, #tpu.memory_space<smem>>, %arg4: memref<5xi32, #tpu.memory_space<smem>>, %arg5: memref<5xi32, #tpu.memory_space<smem>>) -> (i32, i32, i32) {
    %0 = arith.index_cast %arg0 : i32 to index
    %1 = memref.load %arg2[%0] : memref<5xi32, #tpu.memory_space<smem>>
    %c0_i32 = arith.constant 0 : i32
    %c0_i32_0 = arith.constant 0 : i32
    %c0_i32_1 = arith.constant 0 : i32
    return %1, %c0_i32, %c0_i32_0 : i32, i32, i32
  }
  func.func @transform_5(%arg0: i32, %arg1: i32, %arg2: memref<5xi32, #tpu.memory_space<smem>>, %arg3: memref<5xi32, #tpu.memory_space<smem>>, %arg4: memref<5xi32, #tpu.memory_space<smem>>, %arg5: memref<5xi32, #tpu.memory_space<smem>>) -> (i32, i32, i32) {
    %0 = arith.index_cast %arg0 : i32 to index
    %1 = memref.load %arg2[%0] : memref<5xi32, #tpu.memory_space<smem>>
    %2 = arith.index_cast %arg0 : i32 to index
    %3 = memref.load %arg3[%2] : memref<5xi32, #tpu.memory_space<smem>>
    %c0_i32 = arith.constant 0 : i32
    %c0_i32_0 = arith.constant 0 : i32
    return %1, %3, %c0_i32 : i32, i32, i32
  }
}

</mosaic_0001>

<bundles_post_ra>
// kernel: tpu_custom_call.1
= control target key start
LH: loop header
LB: loop body
LE: loop exit
PB: predicated region body
PF: predicated region fallthrough
CT: control target
= control target key end

     0   :  { %s1395_s15 = smov [#allocation4]   ;;  %s1396_s16 = smov [#allocation5]   ;;  %s1730_s0 = inlined_call_operand.vmem [shape: s32[5], index: 0, kind: input, shape index: {}]   ;;  %s1731_s4 = inlined_call_operand.vmem [shape: f32[5], index: 4, kind: input, shape index: {}]   ;;  %s1732_s5 = inlined_call_operand.vmem [shape: s8[5,128,128], index: 5, kind: input, shape index: {}]   ;;  %s1733_s6 = inlined_call_operand.vmem [shape: bf16[5,128,128], index: 6, kind: input, shape index: {}]   ;;  %s1734_s7 = inlined_call_operand.vmem [shape: f32[5,128,1], index: 7, kind: input, shape index: {}]   ;;  %s1735_s8 = inlined_call_operand.vmem [shape: f32[5,1,128], index: 8, kind: input, shape index: {}]   ;;  %s1736_s9 = inlined_call_operand.hbm [shape: f32[5,128,128], index: 9, kind: output, shape index: {}]   ;;  %s1737_s1 = inlined_call_operand.vmem [shape: s32[5], index: 1, kind: input, shape index: {}]   ;;  %s1738_s2 = inlined_call_operand.vmem [shape: s32[5], index: 2, kind: input, shape index: {}]   ;;  %s1739_s3 = inlined_call_operand.vmem [shape: s32[5], index: 3, kind: input, shape index: {}]  }
   0x1   :  { %1743 = sst [smem:[#allocation20_spill]] %s1731_s4  ;;  %s15_s11 = sshll.u32 %s1730_s0, 4  ;;  %s16_s11 = int_to_ptr.vmem [resolvable:$true] %s15_s11 }
   0x2   :  { %1744 = sst [smem:[#allocation21_spill]] %s1732_s5  ;;  %s20_s14 = sshll.u32 %s1737_s1, 4  ;;  %s21_s14 = int_to_ptr.vmem [resolvable:$true] %s20_s14 }
   0x3   :  { %18 = dma.vmem_to_smem %s16_s11, 16, %s1395_s15, [#allocation3] }
   0x4   :  { %23 = dma.vmem_to_smem %s21_s14, 16, %s1396_s16, [#allocation3] }
   0x5   :  { %s25_s19 = sshll.u32 %s1738_s2, 4  ;;  %s30_s22 = sshll.u32 %s1739_s3, 4  ;;  %s26_s19 = int_to_ptr.vmem [resolvable:$true] %s25_s19  ;;  %s31_s22 = int_to_ptr.vmem [resolvable:$true] %s30_s22 }
   0x6   :  { %s1397_s0 = smov [#allocation6]   ;;  %s1398_s23 = smov [#allocation7]  }
   0x7   :  { %28 = dma.vmem_to_smem %s26_s19, 16, %s1397_s0, [#allocation3] }
   0x8   :  { %33 = dma.vmem_to_smem %s31_s22, 16, %s1398_s23, [#allocation3] }
   0x9   :  { %1361 = dma.done.wait [#allocation3], 64 }
   0xa   :  { %1362 = vsyncadd [#allocation3], 4294967232 }
   0xb   :  { %36 = sfence }
   0xc   :  { %37 = vsyncpa [#allocation10], 0 }
   0xd   :  { %38 = vsyncpa [#allocation9], 0 }
   0xe   :  { %40 = vsyncpa [#allocation9 + $0x1], 0  ;;  %s1466_s1 = smov 0   ;;  %s1468_s24 = smov 0  }
   0xf   :  { %s1470_s2 = smov 0   ;;  %s1472_s25 = smov 0  }
  0x10   :  { %s1474_s3 = smov 0   ;;  %s1476_s26 = smov 0  }
  0x11 LB: > { %1745 = sst [smem:[#allocation17_spill]] %s1389_s3  ;;  %s1075_s27 = sadd.s32 4294967295, %s1393_s26   ;;  %s1393_s26 = sphi %s1476_s26, %s46_s26   ;;  %s1389_s3 = sphi %s1474_s3, %s1757_s3   ;;  %s1385_s25 = sphi %s1472_s25, %s1756_s25   ;;  %s1381_s2 = sphi %s1470_s2, %s1760_s2   ;;  %s1377_s24 = sphi %s1468_s24, %s1759_s24   ;;  %s1373_s1 = sphi %s1466_s1, %s1758_s1  }
  0x12   : > { %s1076_s28 = sadd.s32 4294967294, %s1393_s26   ;;  %s58_s29 = sadd.s32 1, %s1389_s3 }
  0x13   : > { %p60_p0 = scmp.ge.s32.totalorder %s58_s29, 5  ;;  %s215_s30 = sld [smem:[#allocation4 + %s1389_s3]] }
  0x14   : > { %s216_s10 = sld [smem:[#allocation5 + %s1389_s3]]  ;;  %p234_p1 = scmp.ne.s32.totalorder %s1381_s2, %s1377_s24 }
  0x15   : > { %s1762_s29 = smov (%p60_p0, %s58_s29), 0  ;;  %p235_p2 = scmp.eq.s32.totalorder %s1075_s27, 4 }
  0x16   : > { %1746 = sst [smem:[#allocation18_spill]] %s1762_s29  ;;  %p240_p3 = scmp.ne.s32.totalorder %s1377_s24, %s1373_s1 }
  0x17   : > { %s217_s11 = sld [smem:[#allocation4 + %s1762_s29]]  ;;  %p241_p4 = scmp.eq.s32.totalorder %s1076_s28, 4 }
  0x18   : > { %s218_s12 = sld [smem:[#allocation5 + %s1762_s29]]  ;;  %p1509_p5 = por %p235_p2, %p234_p1 }
  0x19   : > { %p1513_p6 = por %p241_p4, %p240_p3  ;;  %p1077_p7 = scmp.ge.s32.totalorder %s1393_s26, 1 }
  0x1a   : > { %p248_p8 = scmp.lt.s32.totalorder %s1393_s26, 6  ;;  %p1523_p10 = scmp.eq.s32.totalorder %s1075_s27, 0 }
  0x1b   : > { %s1751_s4 = sld [smem:[#allocation20_spill]]  ;;  %s224_s0 = sadd.s32 1, %s1381_s2 }
  0x1c   : > { %p1519_p9 = pnand %p1077_p7, %p248_p8  ;;  %s1399_s27 = smov [#allocation8]  }
  0x1d   : > { %s219_s17 = ssub.s32 %s215_s30, %s217_s11 }
  0x1e   : > { %s220_s21 = ssub.s32 %s216_s10, %s218_s12  ;;  %p1174_p11 = pneg %p1519_p9 }
  0x1f   : > { %s221_s22 = sor.u32 %s220_s21, %s219_s17 }
  0x20   : > { %p222_p12 = scmp.eq.s32.totalorder %s221_s22, 0  ;;  %p1175_p13 = pnand %p1523_p10, %p1174_p11 }
  0x21   : > { %s260_s20 = sshll.u32 %s1751_s4, 4  ;;  %341 = sbr.rel (%p1519_p9) target bundleno = 435 (0x1b3), region = 40  ;;  %s261_s20 = int_to_ptr.vmem [resolvable:$true] %s260_s20 }
  0x22   : > { %s1536_s23 = scalar_select %p222_p12, %s1381_s2, %s224_s0  }
  0x23   : > { %1177 = dma.vmem_to_smem (!%p1175_p13), %s261_s20, 16, %s1399_s27, [#allocation10]  }
  0x24   : > { %1752 = sst [smem:[#allocation19_spill]] %s1536_s23 }
  0x26   : > { %1364 = dma.done.wait (%p1523_p10), [#allocation10], 16  }
  0x27   : > { %1366 = vsyncadd (%p1523_p10), [#allocation10], 4294967280 }
  0x28   : > { %348 = sfence }
  0x29   : > { %s1740_s28 = sand.u32 1, %s1377_s24   ;;  %s409_s30 = sld [smem:[#allocation4 + %s1385_s25]]  ;;  %v1400_v0 = vmov 0.0  }
  0x2a   : > { %s1548_s10 = sshll.u32 %s1740_s28, 7  ;;  %s410_s11 = sld [smem:[#allocation5 + %s1385_s25]]  ;;  %472 = vst [vmem:[#allocation2 + $0x30] sm:$0xff] %v1400_v0 }
  0x2b   : > { %s412_s12 = sld [smem:[#allocation7 + %s1385_s25]]  ;;  %473 = vst [vmem:[#allocation2] sm:$0xff] %v1400_v0 }
  0x2c   : > { %474 = vst [vmem:[#allocation2 + $0x58] sm:$0xff] %v1400_v0  ;;  %s1553_s15 = sld [smem:[#allocation7 + %s1385_s25]] }
  0x2d   : > { %475 = vst [vmem:[#allocation2 + $0x18] sm:$0xff] %v1400_v0  ;;  %s1556_s16 = sld [smem:[#allocation4 + %s1385_s25]] }
  0x2e   : > { %476 = vst [vmem:[#allocation2 + $0x50] sm:$0xff] %v1400_v0  ;;  %s1559_s17 = sld [smem:[#allocation4 + %s1385_s25]] }
  0x2f   : > { %p414_p0 = scmp.lt.s32.totalorder %s409_s30, 4  ;;  %477 = vst [vmem:[#allocation2 + $0x68] sm:$0xff] %v1400_v0  ;;  %s1562_s19 = sld [smem:[#allocation5 + %s1385_s25]] }
  0x30   : > { %s1083_s18 = sshll.u32 %s410_s11, 2  ;;  %478 = vst [vmem:[#allocation2 + $0x8] sm:$0xff] %v1400_v0  ;;  %s460_s22 = sld [smem:[#allocation4 + %s1385_s25]] }
  0x31   : > { %s1764_s30 = smov (!%p414_p0, %s409_s30), 4  ;;  %479 = vst [vmem:[#allocation2 + $0x48] sm:$0xff] %v1400_v0  ;;  %p416_p1 = scmp.lt.s32.totalorder %s1083_s18, 3 }
  0x32   : > { %p418_p2 = scmp.lt.s32.totalorder %s412_s12, 0  ;;  %480 = vst [vmem:[#allocation2 + $0x40] sm:$0xff] %v1400_v0  ;;  %s1084_s20 = sshll.u32 %s1764_s30, 2 }
  0x33   : > { %s1086_s21 = sshll.u32 %s1553_s15, 4  ;;  %481 = vst [vmem:[#allocation2 + $0x20] sm:$0xff] %v1400_v0  ;;  %s1766_s18 = smov (!%p416_p1, %s1083_s18), 3 }
  0x34   : > { %482 = vst [vmem:[#allocation2 + $0x10] sm:$0xff] %v1400_v0  ;;  %s1768_s12 = smov (!%p418_p2, %s412_s12), 0  ;;  %p434_p3 = scmp.lt.s32.totalorder %s1556_s16, 4 }
  0x35   : > { %483 = vst [vmem:[#allocation2 + $0x38] sm:$0xff] %v1400_v0  ;;  %s420_s0 = sadd.s32 %s1768_s12, %s1766_s18  ;;  %p436_p4 = scmp.lt.s32.totalorder %s1086_s21, 15 }
  0x36   : > { %484 = vst [vmem:[#allocation2 + $0x60] sm:$0xff] %v1400_v0  ;;  %s422_s27 = sadd.s32 %s1084_s20, %s420_s0  ;;  %s1089_s11 = sshll.u32 %s1562_s19, 4 }
  0x37   : > { %485 = vst [vmem:[#allocation2 + $0x70] sm:$0xff] %v1400_v0  ;;  %s1085_s30 = sshll.u32 %s422_s27, 3  ;;  %s1753_s5 = sld [smem:[#allocation21_spill]] }
  0x38   : > { %486 = vst [vmem:[#allocation2 + $0x78] sm:$0xff] %v1400_v0  ;;  %p449_p7 = scmp.lt.s32.totalorder %s1559_s17, 4  ;;  %s1770_s16 = smov (!%p434_p3, %s1556_s16), 4 }
  0x39   : > { %487 = vst [vmem:[#allocation2 + $0x28] sm:$0xff] %v1400_v0  ;;  %s1772_s21 = smov (!%p436_p4, %s1086_s21), 15  ;;  %s1087_s29 = sshll.u32 %s1770_s16, 4 }
  0x3a   : > { %s488_s12 = sld [smem:[#allocation6 + %s1385_s25]]  ;;  %s439_s18 = sadd.s32 %s1087_s29, %s1772_s21 }
  0x3b   : > { %p451_p8 = scmp.lt.s32.totalorder %s1089_s11, 15  ;;  %s1088_s20 = sshll.u32 %s439_s18, 2 }
  0x3c   : > { %s1579_s27 = scalar_lea.vmem %s1733_s6, %s1088_s20  ;;  %s1774_s17 = smov (!%p449_p7, %s1559_s17), 4 }
  0x3d   : > { %s1571_s4 = scalar_lea.vmem %s1753_s5, %s1085_s30  ;;  %s1776_s11 = smov (!%p451_p8, %s1089_s11), 15 }
  0x3e   : > { %s1090_s19 = sshll.u32 %s1774_s17, 4  ;;  %p461_p9 = scmp.lt.s32.totalorder %s460_s22, 4 }
  0x3f   : > { %s454_s28 = sadd.s32 %s1090_s19, %s1776_s11  ;;  %s1594_s21 = scalar_lea.vmem [#allocation11], %s1548_s10 }
  0x40   : > { %s1091_s30 = sshll.u32 %s454_s28, 3  ;;  %s1778_s22 = smov (!%p461_p9, %s460_s22), 4 }
  0x41   : > { %s1585_s23 = scalar_lea.vmem %s1734_s7, %s1091_s30  ;;  %s463_s3 = scalar_lea.vmem %s1735_s8, %s1778_s22 }
  0x42   : > { %p1093_p10 = scmp.le.s32.totalorder %s488_s12, 0 }
  0x44   : > { %492 = sbr.rel (%p1093_p10) target bundleno = 266 (0x10a), region = 52 }
  0x49   : > { %v1139_v1 = vld [vmem:[%s1579_s27 + $0x38] sm:$0xff]  ;;  %v1138_v2 = vld [vmem:[%s1579_s27 + $0x30] sm:$0xff]  ;;  %v1137_v3 = vld [vmem:[%s1579_s27 + $0x28] sm:$0xff] }
  0x4a   : > { %617 = vmatpush.bf16.msra.mxu0 %v1139_v1  ;;  %1140 = vmatpush.bf16.msra.mxu1 %v1139_v1  ;;  %v1136_v4 = vld [vmem:[%s1579_s27 + $0x20] sm:$0xff]  ;;  %v1135_v5 = vld [vmem:[%s1579_s27 + $0x18] sm:$0xff]  ;;  %v1134_v6 = vld [vmem:[%s1579_s27 + $0x10] sm:$0xff] }
  0x4b   : > { %1141 = vmatpush.bf16.msra.mxu2 %v1139_v1  ;;  %1142 = vmatpush.bf16.msra.mxu3 %v1139_v1  ;;  %v493_v7 = vld [vmem:[%s1571_s4] sm:$0xff]  ;;  %v494_v8 = vld [vmem:[%s1571_s4 + $0x8] sm:$0xff]  ;;  %v495_v9 = vld [vmem:[%s1571_s4 + $0x10] sm:$0xff] }
  0x4c   : > { %v496_v10 = vld [vmem:[%s1571_s4 + $0x18] sm:$0xff]  ;;  %v497_v11 = vunpack.c.0.s8 %v493_v7  ;;  %v498_v12 = vunpack.c.1.s8 %v493_v7  ;;  %v501_v13 = vunpack.c.0.s8 %v494_v8  ;;  %v502_v14 = vunpack.c.1.s8 %v494_v8  ;;  %v1133_v15 = vld [vmem:[%s1579_s27 + $0x8] sm:$0xff]  ;;  %v1132_v24 = vld [vmem:[%s1579_s27] sm:$0xff] }
  0x4d   : > { %v505_v16 = vunpack.c.0.s8 %v495_v9  ;;  %v506_v17 = vunpack.c.1.s8 %v495_v9  ;;  %v509_v18 = vunpack.c.0.s8 %v496_v10  ;;  %v510_v19 = vunpack.c.1.s8 %v496_v10  ;;  %v537_v53 = vld [vmem:[#allocation2 + $0x30] sm:$0xff]  ;;  %v545_v59 = vld [vmem:[#allocation2 + $0x40] sm:$0xff]  ;;  %v542_v62 = vld [vmem:[#allocation2 + $0x68] sm:$0xff] }
  0x4e   : > { %618 = vmatpush.bf16.msra.mxu0 %v1138_v2  ;;  %1143 = vmatpush.bf16.msra.mxu1 %v1138_v2  ;;  %v513_v20 = vcvt.s32.f32 %v497_v11  ;;  %v514_v21 = vcvt.s32.f32 %v498_v12  ;;  %v517_v22 = vcvt.s32.f32 %v501_v13  ;;  %v518_v23 = vcvt.s32.f32 %v502_v14  ;;  %v541_v54 = vld [vmem:[#allocation2 + $0x50] sm:$0xff]  ;;  %v549_v60 = vld [vmem:[#allocation2 + $0x60] sm:$0xff] }
  0x4f   : > { %1144 = vmatpush.bf16.msra.mxu2 %v1138_v2  ;;  %1145 = vmatpush.bf16.msra.mxu3 %v1138_v2  ;;  %v521_v25 = vcvt.s32.f32 %v505_v16  ;;  %v522_v26 = vcvt.s32.f32 %v506_v17  ;;  %v525_v27 = vcvt.s32.f32 %v509_v18  ;;  %v526_v28 = vcvt.s32.f32 %v510_v19  ;;  %v538_v61 = vld [vmem:[#allocation2] sm:$0xff]  ;;  %v547_v19 = vld [vmem:[#allocation2 + $0x10] sm:$0xff] }
  0x50   : > { %v529_v29 = vpack.c.bf16 %v514_v21, %v513_v20  ;;  %v531_v30 = vpack.c.bf16 %v518_v23, %v517_v22  ;;  %v499_v33 = vunpack.c.2.s8 %v493_v7  ;;  %v500_v34 = vunpack.c.3.s8 %v493_v7  ;;  %v546_v7 = vld [vmem:[#allocation2 + $0x20] sm:$0xff]  ;;  %v551_v20 = vld [vmem:[#allocation2 + $0x78] sm:$0xff]  ;;  %v544_v22 = vld [vmem:[#allocation2 + $0x48] sm:$0xff] }
  0x51   : > { %v533_v31 = vpack.c.bf16 %v522_v26, %v521_v25  ;;  %v535_v32 = vpack.c.bf16 %v526_v28, %v525_v27  ;;  %v503_v35 = vunpack.c.2.s8 %v494_v8  ;;  %v504_v36 = vunpack.c.3.s8 %v494_v8  ;;  %v550_v8 = vld [vmem:[#allocation2 + $0x70] sm:$0xff]  ;;  %v540_v21 = vld [vmem:[#allocation2 + $0x18] sm:$0xff] }
  0x52   : > { %619 = vmatpush.bf16.msra.mxu0 %v1137_v3  ;;  %1146 = vmatpush.bf16.msra.mxu1 %v1137_v3  ;;  %v507_v37 = vunpack.c.2.s8 %v495_v9  ;;  %v508_v38 = vunpack.c.3.s8 %v495_v9  ;;  %v511_v39 = vunpack.c.2.s8 %v496_v10  ;;  %v512_v40 = vunpack.c.3.s8 %v496_v10  ;;  %v539_v9 = vld [vmem:[#allocation2 + $0x58] sm:$0xff]  ;;  %v543_v10 = vld [vmem:[#allocation2 + $0x8] sm:$0xff] }
  0x53   : > { %1147 = vmatpush.bf16.msra.mxu2 %v1137_v3  ;;  %1148 = vmatpush.bf16.msra.mxu3 %v1137_v3  ;;  %v515_v41 = vcvt.s32.f32 %v499_v33  ;;  %v516_v42 = vcvt.s32.f32 %v500_v34  ;;  %v519_v43 = vcvt.s32.f32 %v503_v35  ;;  %v520_v44 = vcvt.s32.f32 %v504_v36 }
  0x54   : > { %v523_v45 = vcvt.s32.f32 %v507_v37  ;;  %v524_v46 = vcvt.s32.f32 %v508_v38  ;;  %v527_v47 = vcvt.s32.f32 %v511_v39  ;;  %v528_v48 = vcvt.s32.f32 %v512_v40 }
  0x55   : > { %v530_v49 = vpack.c.bf16 %v516_v42, %v515_v41  ;;  %v532_v50 = vpack.c.bf16 %v520_v44, %v519_v43 }
  0x56   : > { %620 = vmatpush.bf16.msra.mxu0 %v1136_v4  ;;  %1149 = vmatpush.bf16.msra.mxu1 %v1136_v4  ;;  %v534_v51 = vpack.c.bf16 %v524_v46, %v523_v45  ;;  %v536_v52 = vpack.c.bf16 %v528_v48, %v527_v47 }
  0x57   : > { %1150 = vmatpush.bf16.msra.mxu2 %v1136_v4  ;;  %1151 = vmatpush.bf16.msra.mxu3 %v1136_v4 }
  0x5a   : > { %621 = vmatpush.bf16.msra.mxu0 %v1135_v5  ;;  %1152 = vmatpush.bf16.msra.mxu1 %v1135_v5 }
  0x5b   : > { %1153 = vmatpush.bf16.msra.mxu2 %v1135_v5  ;;  %1154 = vmatpush.bf16.msra.mxu3 %v1135_v5 }
  0x5e   : > { %622 = vmatpush.bf16.msra.mxu0 %v1134_v6  ;;  %1155 = vmatpush.bf16.msra.mxu1 %v1134_v6 }
  0x5f   : > { %1156 = vmatpush.bf16.msra.mxu2 %v1134_v6  ;;  %1157 = vmatpush.bf16.msra.mxu3 %v1134_v6 }
  0x62   : > { %623 = vmatpush.bf16.msra.mxu0 %v1133_v15  ;;  %1158 = vmatpush.bf16.msra.mxu1 %v1133_v15 }
  0x63   : > { %1159 = vmatpush.bf16.msra.mxu2 %v1133_v15  ;;  %1160 = vmatpush.bf16.msra.mxu3 %v1133_v15 }
  0x66   : > { %624 = vmatpush.bf16.msra.mxu0 %v1132_v24  ;;  %1161 = vmatpush.bf16.msra.mxu1 %v1132_v24 }
  0x67   : > { %1162 = vmatpush.bf16.msra.mxu2 %v1132_v24  ;;  %1163 = vmatpush.bf16.msra.mxu3 %v1132_v24 }
  0x69   : > { %625 = vmatmul.bf16.vlgmr.msra.gmra.mxu0 %v529_v29  ;;  %635 = vmatmul.bf16.vlgmr.msra.gmra.mxu1 %v531_v30 }
  0x6a   : > { %645 = vmatmul.bf16.vlgmr.msra.gmra.mxu2 %v533_v31  ;;  %655 = vmatmul.bf16.vlgmr.msra.gmra.mxu3 %v535_v32  ;;  %v548_v31 = vld [vmem:[#allocation2 + $0x38] sm:$0xff]  ;;  %v552_v32 = vld [vmem:[#allocation2 + $0x28] sm:$0xff] }
  0x79   : > { %630 = vmatmul.bf16.gmra.mxu0 %v530_v49  ;;  %640 = vmatmul.bf16.gmra.mxu1 %v532_v50 }
  0x7a   : > { %650 = vmatmul.bf16.gmra.mxu2 %v534_v51  ;;  %660 = vmatmul.bf16.gmra.mxu3 %v536_v52 }
  0xe6   : > { %v626_v55 = vpop.f32.mrf.mxu0  ;;  %v636_v56 = vpop.f32.mrf.mxu1 }
  0xe7   : > { %v666_v57 = vadd.f32 %v626_v55, %v537_v53  ;;  %v670_v58 = vadd.f32 %v636_v56, %v541_v54 }
  0xe9   : > { %682 = vst [vmem:[#allocation2 + $0x30] sm:$0xff] %v666_v57 }
  0xea   : > { %686 = vst [vmem:[#allocation2 + $0x50] sm:$0xff] %v670_v58 }
  0xed   : > { %v646_v63 = vpop.f32.mrf.mxu2  ;;  %v656_v0 = vpop.f32.mrf.mxu3 }
  0xee   : > { %v674_v1 = vadd.f32 %v646_v63, %v545_v59  ;;  %v678_v2 = vadd.f32 %v656_v0, %v549_v60  ;;  %v628_v3 = vpop.f32.mrf.mxu0  ;;  %v638_v4 = vpop.f32.mrf.mxu1 }
  0xef   : > { %v667_v5 = vadd.f32 %v628_v3, %v538_v61  ;;  %v671_v6 = vadd.f32 %v638_v4, %v542_v62 }
  0xf0   : > { %690 = vst [vmem:[#allocation2 + $0x40] sm:$0xff] %v674_v1 }
  0xf1   : > { %694 = vst [vmem:[#allocation2 + $0x60] sm:$0xff] %v678_v2 }
  0xf2   : > { %683 = vst [vmem:[#allocation2] sm:$0xff] %v667_v5 }
  0xf3   : > { %687 = vst [vmem:[#allocation2 + $0x68] sm:$0xff] %v671_v6 }
  0xf5   : > { %v648_v11 = vpop.f32.mrf.mxu2  ;;  %v658_v12 = vpop.f32.mrf.mxu3 }
  0xf6   : > { %v675_v13 = vadd.f32 %v648_v11, %v546_v7  ;;  %v679_v14 = vadd.f32 %v658_v12, %v550_v8  ;;  %v631_v15 = vpop.f32.mrf.mxu0  ;;  %v641_v16 = vpop.f32.mrf.mxu1 }
  0xf7   : > { %v668_v17 = vadd.f32 %v631_v15, %v539_v9  ;;  %v672_v18 = vadd.f32 %v641_v16, %v543_v10 }
  0xf8   : > { %691 = vst [vmem:[#allocation2 + $0x20] sm:$0xff] %v675_v13 }
  0xf9   : > { %695 = vst [vmem:[#allocation2 + $0x70] sm:$0xff] %v679_v14 }
  0xfa   : > { %684 = vst [vmem:[#allocation2 + $0x58] sm:$0xff] %v668_v17 }
  0xfb   : > { %688 = vst [vmem:[#allocation2 + $0x8] sm:$0xff] %v672_v18 }
  0xfd   : > { %v651_v23 = vpop.f32.mrf.mxu2  ;;  %v661_v24 = vpop.f32.mrf.mxu3 }
  0xfe   : > { %v676_v25 = vadd.f32 %v651_v23, %v547_v19  ;;  %v680_v26 = vadd.f32 %v661_v24, %v551_v20  ;;  %v633_v27 = vpop.f32.mrf.mxu0  ;;  %v643_v28 = vpop.f32.mrf.mxu1 }
  0xff   : > { %v669_v29 = vadd.f32 %v633_v27, %v540_v21  ;;  %v673_v30 = vadd.f32 %v643_v28, %v544_v22 }
 0x100   : > { %692 = vst [vmem:[#allocation2 + $0x10] sm:$0xff] %v676_v25 }
 0x101   : > { %696 = vst [vmem:[#allocation2 + $0x78] sm:$0xff] %v680_v26 }
 0x102   : > { %685 = vst [vmem:[#allocation2 + $0x18] sm:$0xff] %v669_v29 }
 0x103   : > { %689 = vst [vmem:[#allocation2 + $0x48] sm:$0xff] %v673_v30 }
 0x105   : > { %v653_v33 = vpop.f32.mrf.mxu2  ;;  %v663_v34 = vpop.f32.mrf.mxu3 }
 0x106   : > { %v677_v35 = vadd.f32 %v653_v33, %v548_v31  ;;  %v681_v36 = vadd.f32 %v663_v34, %v552_v32 }
 0x108   : > { %693 = vst [vmem:[#allocation2 + $0x38] sm:$0xff] %v677_v35 }
 0x109   : > { %697 = vst [vmem:[#allocation2 + $0x28] sm:$0xff] %v681_v36 }
 0x10a PF: > { %v723_v37 = vld [vmem:[%s1585_s23 + $0x20] sm:$0xff]  ;;  %v721_v38 = vld [vmem:[%s1585_s23 + $0x10] sm:$0xff]  ;;  %v1401_v40 = vmov 0   ;;  %v724_v41 = vld [vmem:[%s1585_s23 + $0x28] sm:$0xff]  ;;  %s701_s4 = sld [smem:[#allocation4 + %s1385_s25]]  ;;  %s1780_s25 = smov (!%p1509_p5, %s1385_s25), 0 }
 0x10b   : > { %v719_v39 = vld [vmem:[%s1585_s23] sm:$0xff]  ;;  %1244 = vset.pattern.permute.xlu2 %v1401_v40  ;;  %1243 = vset.pattern.permute.xlu1 %v1401_v40  ;;  %v722_v42 = vld [vmem:[%s1585_s23 + $0x18] sm:$0xff]  ;;  %v720_v43 = vld [vmem:[%s1585_s23 + $0x8] sm:$0xff]  ;;  %s1170_s22 = scalar_select %p1509_p5, [#allocation5], [#allocation13] }
 0x10c   : > { %1242 = vset.pattern.permute.xlu0 %v1401_v40  ;;  %757 = vperm.xlu2 %1244, %v723_v37   ;;  %v727_v44 = vld [vmem:[%s1585_s23 + $0x40] sm:$0xff]  ;;  %v726_v45 = vld [vmem:[%s1585_s23 + $0x38] sm:$0xff]  ;;  %v725_v46 = vld [vmem:[%s1585_s23 + $0x30] sm:$0xff]  ;;  %s933_s30 = sshll.u32 %s1594_s21, 4  ;;  %s1754_s29 = sand.u32 1, %s1377_s24   ;;  %s934_s30 = int_to_ptr.vmem [resolvable:$true] %s933_s30 }
 0x10d   : > { %747 = vperm.xlu1 %1243, %v721_v38   ;;  %737 = vperm.xlu0 %1242, %v719_v39   ;;  %v730_v47 = vld [vmem:[%s1585_s23 + $0x58] sm:$0xff]  ;;  %v729_v48 = vld [vmem:[%s1585_s23 + $0x50] sm:$0xff]  ;;  %v728_v49 = vld [vmem:[%s1585_s23 + $0x48] sm:$0xff]  ;;  %s925_s12 = sld [smem:[%s1170_s22 + %s1780_s25]]  ;;  %s917_s16 = scalar_lea.sflag [#allocation9], %s1754_s29 }
 0x10e   : > { %v733_v50 = vld [vmem:[%s1585_s23 + $0x70] sm:$0xff]  ;;  %v732_v51 = vld [vmem:[%s1585_s23 + $0x68] sm:$0xff]  ;;  %v731_v52 = vld [vmem:[%s1585_s23 + $0x60] sm:$0xff]  ;;  %s1329_s17 = scalar_lea.hbm %s1736_s9, 640 }
 0x10f   : > { %v734_v53 = vld [vmem:[%s1585_s23 + $0x78] sm:$0xff]  ;;  %v707_v54 = vld [vmem:[#allocation2 + $0x50] sm:$0xff]  ;;  %v1630_v56 = vld [vmem:[%s463_s3] ss:$0 sm:$0xff]  ;;  %s1168_s23 = scalar_select %p1509_p5, [#allocation4], [#allocation12] }
 0x110   : > { %s702_s5 = sld [smem:[#allocation8 + %s701_s4]]  ;;  %v708_v61 = vld [vmem:[#allocation2 + $0x68] sm:$0xff]  ;;  %v711_v3 = vld [vmem:[#allocation2 + $0x40] sm:$0xff]  ;;  %v714_v9 = vld [vmem:[#allocation2 + $0x38] sm:$0xff] }
 0x111   : > { %v705_v11 = vld [vmem:[#allocation2 + $0x58] sm:$0xff]  ;;  %v703_v12 = vld [vmem:[#allocation2 + $0x30] sm:$0xff]  ;;  %v704_v28 = vld [vmem:[#allocation2] sm:$0xff]  ;;  %s1672_s11 = sld [smem:[%s1168_s23 + %s1780_s25]] }
 0x112   : > { %v717_v25 = vld [vmem:[#allocation2 + $0x78] sm:$0xff] }
 0x113   : > { %v706_v27 = vld [vmem:[#allocation2 + $0x18] sm:$0xff]  ;;  %s1127_s25 = sshll.u32 %s925_s12, 4 }
 0x114   : > { %762 = vperm.xlu2 %1244, %v724_v41  }
 0x115   : > { %752 = vperm.xlu1 %1243, %v722_v42   ;;  %742 = vperm.xlu0 %1242, %v720_v43  }
 0x116   : > { %v1633_v59 = vstv %s702_s5 }
 0x117   : > { %s1128_s18 = sshll.u32 %s1672_s11, 4 }
 0x118   : > { %s930_s20 = sadd.s32 %s1128_s18, %s1127_s25 }
 0x119   : > { %s1129_s0 = sshll.u32 %s930_s20, 3 }
 0x11a   : > { %s932_s28 = scalar_lea.hbm %s1736_s9, %s1129_s0 }
 0x11b   : > { %s935_s15 = sshll.u32 %s932_s28, 4  ;;  %s936_s15 = int_to_ptr.hbm [resolvable:$true] %s935_s15 }
 0x11c   : > { %777 = vperm.xlu2 %1244, %v727_v44   ;;  %v710_v44 = vld [vmem:[#allocation2 + $0x48] sm:$0xff]  ;;  %s1323_s3 = sshra.s32 %s936_s15, 4  ;;  %s1324_s3 = int_to_ptr.hbm [resolvable:$true] %s1323_s3 }
 0x11d   : > { %772 = vperm.xlu1 %1243, %v726_v45   ;;  %767 = vperm.xlu0 %1242, %v725_v46   ;;  %v709_v45 = vld [vmem:[#allocation2 + $0x8] sm:$0xff]  ;;  %s1325_s4 = scalar_lea.hbm %s1324_s3, 128  ;;  %p1330_p0 = scmp.lt.s32.totalorder %s1324_s3, %s1736_s9 }
 0x11e   : > { %p1326_p11 = scmp.ne.s32.totalorder %s1324_s3, %s1325_s4  ;;  %p1331_p1 = scmp.lt.s32.totalorder %s1329_s17, %s1325_s4 }
 0x120   : > { %p1327_p12 = pnand %p1326_p11, %p1509_p5  ;;  %p1332_p2 = por %p1331_p1, %p1330_p0 }
 0x122   : > { %p1328_p13 = pneg %p1327_p12 }
 0x124   : > { %792 = vperm.xlu2 %1244, %v730_v47   ;;  %p1333_p3 = pnand %p1332_p2, %p1328_p13 }
 0x125   : > { %787 = vperm.xlu1 %1243, %v729_v48   ;;  %782 = vperm.xlu0 %1242, %v728_v49  }
 0x12c   : > { %807 = vperm.xlu2 %1244, %v733_v50  }
 0x12d   : > { %802 = vperm.xlu1 %1243, %v732_v51   ;;  %797 = vperm.xlu0 %1242, %v731_v52  }
 0x135   : > { %812 = vperm.xlu0 %1242, %v734_v53  }
 0x166   : > { %v758_v55 = vpop.permute.xlu2 %757 }
 0x167   : > { %v819_v57 = vmul.f32 %v758_v55, %v707_v54 }
 0x169   : > { %v839_v58 = vadd.f32 %v1630_v56, %v819_v57  ;;  %v713_v57 = vld [vmem:[#allocation2 + $0x10] sm:$0xff] }
 0x16b   : > { %vm855_vm0 = vcmp.gt.f32.partialorder %v839_v58, 0.0  ;;  %v872_v60 = vmul.f32 %v1633_v59, %v839_v58 }
 0x16d   : > { %v888_v62 = vsel %vm855_vm0, %v839_v58, %v872_v60  ;;  %v712_v58 = vld [vmem:[#allocation2 + $0x20] sm:$0xff] }
 0x16e   : > { %904 = vst [vmem:[%s1594_s21 + $0x20] sm:$0xff] %v888_v62  ;;  %v763_v63 = vpop.permute.xlu2 %762 }
 0x16f   : > { %v820_v0 = vmul.f32 %v763_v63, %v708_v61 }
 0x171   : > { %v840_v1 = vadd.f32 %v1630_v56, %v820_v0 }
 0x173   : > { %vm856_vm1 = vcmp.gt.f32.partialorder %v840_v1, 0.0  ;;  %v873_v2 = vmul.f32 %v1633_v59, %v840_v1 }
 0x175   : > { %v889_v4 = vsel %vm856_vm1, %v840_v1, %v873_v2 }
 0x176   : > { %905 = vst [vmem:[%s1594_s21 + $0x28] sm:$0xff] %v889_v4  ;;  %v778_v5 = vpop.permute.xlu2 %777 }
 0x177   : > { %v823_v6 = vmul.f32 %v778_v5, %v711_v3 }
 0x179   : > { %v843_v7 = vadd.f32 %v1630_v56, %v823_v6  ;;  %v716_v6 = vld [vmem:[#allocation2 + $0x70] sm:$0xff] }
 0x17b   : > { %vm859_vm2 = vcmp.gt.f32.partialorder %v843_v7, 0.0  ;;  %v876_v8 = vmul.f32 %v1633_v59, %v843_v7 }
 0x17d   : > { %v892_v10 = vsel %vm859_vm2, %v843_v7, %v876_v8  ;;  %v715_v7 = vld [vmem:[#allocation2 + $0x60] sm:$0xff] }
 0x17e   : > { %908 = vst [vmem:[%s1594_s21 + $0x40] sm:$0xff] %v892_v10  ;;  %v793_v13 = vpop.permute.xlu2 %792 }
 0x17f   : > { %v826_v14 = vmul.f32 %v793_v13, %v714_v9  ;;  %v748_v15 = vpop.permute.xlu1 %747  ;;  %v738_v16 = vpop.permute.xlu0 %737 }
 0x180   : > { %v817_v17 = vmul.f32 %v748_v15, %v705_v11  ;;  %v815_v18 = vmul.f32 %v738_v16, %v703_v12 }
 0x181   : > { %v846_v19 = vadd.f32 %v1630_v56, %v826_v14 }
 0x182   : > { %v837_v20 = vadd.f32 %v1630_v56, %v817_v17  ;;  %v835_v21 = vadd.f32 %v1630_v56, %v815_v18  ;;  %v718_v18 = vld [vmem:[#allocation2 + $0x28] sm:$0xff] }
 0x183   : > { %vm862_vm3 = vcmp.gt.f32.partialorder %v846_v19, 0.0  ;;  %v879_v22 = vmul.f32 %v1633_v59, %v846_v19 }
 0x184   : > { %vm853_vm4 = vcmp.gt.f32.partialorder %v837_v20, 0.0  ;;  %v870_v23 = vmul.f32 %v1633_v59, %v837_v20  ;;  %vm851_vm5 = vcmp.gt.f32.partialorder %v835_v21, 0.0  ;;  %v868_v24 = vmul.f32 %v1633_v59, %v835_v21 }
 0x185   : > { %v895_v26 = vsel %vm862_vm3, %v846_v19, %v879_v22 }
 0x186   : > { %911 = vst [vmem:[%s1594_s21 + $0x58] sm:$0xff] %v895_v26  ;;  %v886_v29 = vsel %vm853_vm4, %v837_v20, %v870_v23  ;;  %v884_v30 = vsel %vm851_vm5, %v835_v21, %v868_v24  ;;  %v808_v31 = vpop.permute.xlu2 %807 }
 0x187   : > { %902 = vst [vmem:[%s1594_s21 + $0x10] sm:$0xff] %v886_v29  ;;  %v829_v32 = vmul.f32 %v808_v31, %v717_v25  ;;  %v753_v33 = vpop.permute.xlu1 %752  ;;  %v743_v34 = vpop.permute.xlu0 %742 }
 0x188   : > { %900 = vst [vmem:[%s1594_s21] sm:$0xff] %v884_v30  ;;  %v818_v35 = vmul.f32 %v753_v33, %v706_v27  ;;  %v816_v36 = vmul.f32 %v743_v34, %v704_v28 }
 0x189   : > { %v849_v37 = vadd.f32 %v1630_v56, %v829_v32 }
 0x18a   : > { %v838_v38 = vadd.f32 %v1630_v56, %v818_v35  ;;  %v836_v39 = vadd.f32 %v1630_v56, %v816_v36 }
 0x18b   : > { %vm865_vm6 = vcmp.gt.f32.partialorder %v849_v37, 0.0  ;;  %v882_v40 = vmul.f32 %v1633_v59, %v849_v37 }
 0x18c   : > { %vm854_vm7 = vcmp.gt.f32.partialorder %v838_v38, 0.0  ;;  %v871_v41 = vmul.f32 %v1633_v59, %v838_v38  ;;  %vm852_vm8 = vcmp.gt.f32.partialorder %v836_v39, 0.0  ;;  %v869_v42 = vmul.f32 %v1633_v59, %v836_v39 }
 0x18d   : > { %v898_v43 = vsel %vm865_vm6, %v849_v37, %v882_v40 }
 0x18e   : > { %914 = vst [vmem:[%s1594_s21 + $0x70] sm:$0xff] %v898_v43  ;;  %v887_v46 = vsel %vm854_vm7, %v838_v38, %v871_v41  ;;  %v885_v47 = vsel %vm852_vm8, %v836_v39, %v869_v42 }
 0x18f   : > { %903 = vst [vmem:[%s1594_s21 + $0x18] sm:$0xff] %v887_v46  ;;  %v773_v48 = vpop.permute.xlu1 %772  ;;  %v768_v49 = vpop.permute.xlu0 %767 }
 0x190   : > { %901 = vst [vmem:[%s1594_s21 + $0x8] sm:$0xff] %v885_v47  ;;  %v822_v50 = vmul.f32 %v773_v48, %v710_v44  ;;  %v821_v51 = vmul.f32 %v768_v49, %v709_v45 }
 0x192   : > { %v842_v52 = vadd.f32 %v1630_v56, %v822_v50  ;;  %v841_v53 = vadd.f32 %v1630_v56, %v821_v51 }
 0x194   : > { %vm858_vm9 = vcmp.gt.f32.partialorder %v842_v52, 0.0  ;;  %v875_v54 = vmul.f32 %v1633_v59, %v842_v52  ;;  %vm857_vm10 = vcmp.gt.f32.partialorder %v841_v53, 0.0  ;;  %v874_v55 = vmul.f32 %v1633_v59, %v841_v53 }
 0x196   : > { %v891_v60 = vsel %vm858_vm9, %v842_v52, %v875_v54  ;;  %v890_v61 = vsel %vm857_vm10, %v841_v53, %v874_v55 }
 0x197   : > { %907 = vst [vmem:[%s1594_s21 + $0x38] sm:$0xff] %v891_v60  ;;  %v788_v62 = vpop.permute.xlu1 %787  ;;  %v783_v63 = vpop.permute.xlu0 %782 }
 0x198   : > { %906 = vst [vmem:[%s1594_s21 + $0x30] sm:$0xff] %v890_v61  ;;  %v825_v0 = vmul.f32 %v788_v62, %v713_v57  ;;  %v824_v1 = vmul.f32 %v783_v63, %v712_v58 }
 0x19a   : > { %v845_v2 = vadd.f32 %v1630_v56, %v825_v0  ;;  %v844_v3 = vadd.f32 %v1630_v56, %v824_v1 }
 0x19c   : > { %vm861_vm11 = vcmp.gt.f32.partialorder %v845_v2, 0.0  ;;  %v878_v4 = vmul.f32 %v1633_v59, %v845_v2  ;;  %vm860_vm12 = vcmp.gt.f32.partialorder %v844_v3, 0.0  ;;  %v877_v5 = vmul.f32 %v1633_v59, %v844_v3 }
 0x19e   : > { %v894_v8 = vsel %vm861_vm11, %v845_v2, %v878_v4  ;;  %v893_v9 = vsel %vm860_vm12, %v844_v3, %v877_v5 }
 0x19f   : > { %910 = vst [vmem:[%s1594_s21 + $0x50] sm:$0xff] %v894_v8  ;;  %v803_v10 = vpop.permute.xlu1 %802  ;;  %v798_v11 = vpop.permute.xlu0 %797 }
 0x1a0   : > { %909 = vst [vmem:[%s1594_s21 + $0x48] sm:$0xff] %v893_v9  ;;  %v828_v12 = vmul.f32 %v803_v10, %v716_v6  ;;  %v827_v13 = vmul.f32 %v798_v11, %v715_v7 }
 0x1a2   : > { %v848_v14 = vadd.f32 %v1630_v56, %v828_v12  ;;  %v847_v15 = vadd.f32 %v1630_v56, %v827_v13 }
 0x1a4   : > { %vm864_vm13 = vcmp.gt.f32.partialorder %v848_v14, 0.0  ;;  %v881_v16 = vmul.f32 %v1633_v59, %v848_v14  ;;  %vm863_vm14 = vcmp.gt.f32.partialorder %v847_v15, 0.0  ;;  %v880_v17 = vmul.f32 %v1633_v59, %v847_v15 }
 0x1a6   : > { %v897_v19 = vsel %vm864_vm13, %v848_v14, %v881_v16  ;;  %v896_v20 = vsel %vm863_vm14, %v847_v15, %v880_v17 }
 0x1a7   : > { %913 = vst [vmem:[%s1594_s21 + $0x68] sm:$0xff] %v897_v19  ;;  %v813_v21 = vpop.permute.xlu0 %812 }
 0x1a8   : > { %912 = vst [vmem:[%s1594_s21 + $0x60] sm:$0xff] %v896_v20  ;;  %v830_v22 = vmul.f32 %v813_v21, %v718_v18 }
 0x1aa   : > { %v850_v23 = vadd.f32 %v1630_v56, %v830_v22 }
 0x1ac   : > { %vm866_vm15 = vcmp.gt.f32.partialorder %v850_v23, 0.0  ;;  %v883_v24 = vmul.f32 %v1633_v59, %v850_v23 }
 0x1ae   : > { %v899_v25 = vsel %vm866_vm15, %v850_v23, %v883_v24 }
 0x1af   : > { %915 = vst [vmem:[%s1594_s21 + $0x78] sm:$0xff] %v899_v25 }
 0x1b0   : > { %1336 = shalt.err (!%p1333_p3)
}
 0x1b1   : > { %s1402_s21 = smov 128   ;;  %s1403_s11 = smov 8  }
 0x1b2   : > { %1172 = dma.vmem_to_hbm [thread:$0]  (%p1509_p5), %s934_s30, 2048, %s936_s15, %s917_s16, %s1402_s21, %s1402_s21, %s1403_s11  }
 0x1b3 PF: > { %p1184_p4 = scmp.ge.s32.totalorder %s1393_s26, 2  ;;  %s950_s12 = sand.u32 1, %s1373_s1  }
 0x1b4   : > { %s951_s25 = scalar_lea.sflag [#allocation9], %s950_s12 }
 0x1b5   : > { %p1179_p7 = pnand %p1184_p4, %p1513_p6 }
 0x1b7   : > { %p1180_p8 = pneg %p1179_p7 }
 0x1b9   : > { %1368 = dma.done.wait (%p1180_p8), %s951_s25, 2048  }
 0x1ba   : > { %1370 = vsyncadd (%p1180_p8), %s951_s25, 4294965248  ;;  %s46_s26 = sadd.s32 1, %s1393_s26   ;;  %s1755_s18 = sld [smem:[#allocation19_spill]] }
 0x1bb   : > { %p43_p9 = scmp.ge.s32.totalorder %s46_s26, 7   ;;  %s1756_s25 = sld [smem:[#allocation17_spill]] }
 0x1bc   : > { %s1757_s3 = sld [smem:[#allocation18_spill]]  ;;  %s1758_s1 = smov %s1377_s24 }
 0x1bd   : > { %s1759_s24 = smov %s1381_s2  ;;  %45 = sbr.rel (!%p43_p9) target bundleno = 17 (0x11), region = 101 }
 0x1c0   : > { %s1760_s2 = smov %s1755_s18 }
 0x1c2   :  { %957 = vsyncpa [#allocation9], 1 }
 0x1c3   :  { %959 = vsyncpa [#allocation9 + $0x1], 1 }
 0x1c4   :  { %960 = vsyncpa [#allocation10], 1 }
 0x1c5   :  { %962 = vsyncpa [#allocation10 + $0x1], 1 }

</bundles_post_ra>
